<compile_context>
chip_gen: v7x
topology: tpu7x:2x2x1
jax: 0.10.0
libtpu: 0.0.40
codegen_flags: <defaults>
</compile_context>

<pallas_src>
import functools
import itertools

import numpy as np

import jax
import jax.numpy as jnp
from jax.experimental import pallas as pl
from jax.experimental.pallas import tpu as pltpu


def _cdiv(a, m):
    return -(-a // m)


def _round_up(a, m):
    return _cdiv(a, m) * m


def _pick_tiling(extent, align, cap, min_tiles=1):
    """Split `extent` into the fewest near-equal, `align`-multiple tiles.

    Returns (tile, padded_extent) with padded_extent = n_tiles * tile and
    padding limited to < align * n_tiles (review #4: no padding to a huge
    tile cap)."""
    e = _round_up(max(int(extent), 1), align)
    n = max(int(min_tiles), _cdiv(e, cap))
    tile = _round_up(_cdiv(e, n), align)
    return tile, n * tile


def premise_kernel(x_ref, mask_ref, out_ref, *, mfs_counts, n_mfs_max):
    """out[b, r] = prod_v x[b, v, idx[v, r]] for one (B_tile, R_tile) block.

    x_ref:    (B_tile, V * n_mfs_max)  membership degrees, batch on sublanes.
    mask_ref: (n_mask_rows, R_tile)    int32 0/1; row(v, m) is 1 where rule r
                                       selects MF m (m >= 1) for variable v.
    out_ref:  (B_tile, R_tile)         lane-dense rule activations.
    """
    shape = out_ref.shape                        # (B_tile, R_tile)
    acc = None
    row = 0
    for v, mv in enumerate(mfs_counts):          # V is small & static
        base = v * n_mfs_max
        # Default选: MF index 0 for this variable.
        col0 = x_ref[:, base:base + 1].astype(jnp.float32)        # (B_tile, 1)
        ants = jnp.broadcast_to(col0, shape)                       # lane bcast
        for m in range(1, mv):                   # true per-variable MF count
            colb = jnp.broadcast_to(
                x_ref[:, base + m:base + m + 1].astype(jnp.float32), shape)
            # Precomputed rule mask row. The `!= 0` runs on a (1, R_tile) row
            # (negligible VALU cost); the only full-size op per (v, m) is the
            # select below. The bool sublane-broadcast goes to a non-VALU slot.
            mask = jnp.broadcast_to(mask_ref[row:row + 1, :] != 0, shape)
            ants = jnp.where(mask, colb, ants)
            row += 1
        acc = ants if acc is None else acc * ants                  # prod over V
    out_ref[...] = acc.astype(out_ref.dtype)


def make_mf_indices(mfs_counts):
    """Cartesian product of MF indices, like PremiseLayer.__init__."""
    idx = list(itertools.product(*[range(n) for n in mfs_counts]))
    return jnp.asarray(idx, dtype=jnp.int32)     # (R, V)


def _make_rule_masks(mfs_counts, r_pad):
    """Host-constant 0/1 mask table: one row per (variable v, mf m >= 1)."""
    mf_indices = np.asarray(
        list(itertools.product(*[range(n) for n in mfs_counts])), dtype=np.int32)
    R = mf_indices.shape[0]
    rows = []
    for v, mv in enumerate(mfs_counts):
        for m in range(1, mv):
            rows.append(mf_indices[:, v] == m)
    if not rows:                                  # degenerate: every Mv == 1
        rows.append(np.zeros((R,), dtype=bool))
    masks = np.stack(rows, axis=0).astype(np.int32)        # (n_rows, R)
    masks = np.pad(masks, ((0, 0), (0, r_pad - R)))
    return masks, R


def premise_layer(x, mfs_counts, *, b_tile_cap=256, r_tile_cap=4096):
    """Pallas forward of PremiseLayer for x of shape (B, V, M_max)."""
    mfs_counts = tuple(int(m) for m in mfs_counts)
    B, V, M = x.shape
    assert V == len(mfs_counts) and M >= max(mfs_counts)
    R = int(np.prod(mfs_counts))

    # Sublane-aligned batch tiling.
    b_tile, b_pad = _pick_tiling(B, 8, b_tile_cap)
    # Lane-dense rule tiling; pad only to a 128 multiple of a near-equal
    # split (review #4). For v7x megacore, make sure a big single-block
    # problem still yields >= 2 "parallel" grid steps (review #7).
    r128 = _round_up(R, 128)
    min_r_tiles = 2 if (b_pad == b_tile and r128 >= 1024) else 1
    r_tile, r_pad = _pick_tiling(R, 128, r_tile_cap, min_tiles=min_r_tiles)

    # Host-constant rule masks, lane-dense along rules.
    masks, _ = _make_rule_masks(mfs_counts, r_pad)
    n_mask_rows = masks.shape[0]

    # x laid out as (B_pad, V*M): last dim is the full (tiny) V*M extent.
    x2 = jnp.pad(x.reshape(B, V * M), ((0, b_pad - B), (0, 0)))

    # VMEM per step (double-buffered): <= 2*(b_tile*r_tile*4) out
    # + tiny inputs ~= 9 MiB at the default caps -> inside the scoped-VMEM
    # default on v5e (16 MiB), v6e and v7x (32 MiB); no vmem_limit needed.
    out = pl.pallas_call(
        functools.partial(premise_kernel, mfs_counts=mfs_counts, n_mfs_max=M),
        out_shape=jax.ShapeDtypeStruct((b_pad, r_pad), x.dtype),
        grid=(b_pad // b_tile, r_pad // r_tile),
        in_specs=[
            pl.BlockSpec((b_tile, V * M), lambda i, j: (i, 0)),
            pl.BlockSpec((n_mask_rows, r_tile), lambda i, j: (0, j)),
        ],
        out_specs=pl.BlockSpec((b_tile, r_tile), lambda i, j: (i, j)),
        compiler_params=pltpu.CompilerParams(
            dimension_semantics=("parallel", "parallel")),
    )(x2, jnp.asarray(masks))
    return out[:B, :R]


def premise_ref(x, mf_indices):
    """Pure-JAX reference mirroring the torch.gather + prod implementation."""
    B = x.shape[0]
    xt = jnp.transpose(x, (0, 2, 1))                             # (B, M, V)
    idx = jnp.broadcast_to(mf_indices[None], (B,) + mf_indices.shape)
    ants = jnp.take_along_axis(xt, idx, axis=1)                  # (B, R, V)
    return jnp.prod(ants, axis=2)                                # (B, R)


if __name__ == "__main__":
    key = jax.random.PRNGKey(0)
    k1, k2 = jax.random.split(key)

    # Case 1: 4 variables x 3 MFs -> 81 rules, batch 2 (small module config).
    mfs_counts = (3, 3, 3, 3)
    mf_indices = make_mf_indices(mfs_counts)                     # (81, 4)
    x = jax.random.uniform(k1, (2, len(mfs_counts), max(mfs_counts)),
                           dtype=jnp.float32)
    out = jax.block_until_ready(premise_layer(x, mfs_counts))
    ref = premise_ref(x, mf_indices)
    assert out.shape == (2, mf_indices.shape[0])
    assert jnp.allclose(out, ref, atol=1e-5, rtol=1e-5)

    # Case 2: mixed MF counts -> 648 rules; now a single 768-wide R tile.
    mfs_counts2 = (3, 2, 4, 3, 3, 3)
    mf_indices2 = make_mf_indices(mfs_counts2)
    x2 = jax.random.uniform(k2, (10, len(mfs_counts2), max(mfs_counts2)),
                            dtype=jnp.float32)
    out2 = jax.block_until_ready(premise_layer(x2, mfs_counts2))
    ref2 = premise_ref(x2, mf_indices2)
    assert out2.shape == (10, mf_indices2.shape[0])
    assert jnp.allclose(out2, ref2, atol=1e-5, rtol=1e-5)

    print("KERNEL_OK")
</pallas_src>

<mosaic_0001>
module attributes {stable_mosaic.version = 11 : i64} {
  func.func @premise_kernel(%arg0: i32, %arg1: i32, %arg2: memref<8x12xf32, #tpu.memory_space<vmem>>, %arg3: memref<8x128xi32, #tpu.memory_space<vmem>>, %arg4: memref<8x128xf32, #tpu.memory_space<vmem>>) attributes {dimension_semantics = [#tpu.dimension_semantics<parallel>, #tpu.dimension_semantics<parallel>], iteration_bounds = array<i64: 1, 1>, scalar_prefetch = 0 : i64, scratch_operands = 0 : i64, tpu.core_type = #tpu.core_type<tc>, window_params = [{transform_indices = @transform_0, window_bounds = array<i64: 8, 12>}, {transform_indices = @transform_1, window_bounds = array<i64: 8, 128>}, {transform_indices = @transform_2, window_bounds = array<i64: 8, 128>}]} {
    %c0 = arith.constant 0 : index
    %c0_0 = arith.constant 0 : index
    %0 = vector.load %arg2[%c0, %c0_0] : memref<8x12xf32, #tpu.memory_space<vmem>>, vector<8x1xf32>
    %1 = vector.shape_cast %0 : vector<8x1xf32> to vector<8x1xf32>
    %2 = vector.broadcast %1 : vector<8x1xf32> to vector<8x128xf32>
    %c0_1 = arith.constant 0 : index
    %c1 = arith.constant 1 : index
    %3 = vector.load %arg2[%c0_1, %c1] : memref<8x12xf32, #tpu.memory_space<vmem>>, vector<8x1xf32>
    %4 = vector.shape_cast %3 : vector<8x1xf32> to vector<8x1xf32>
    %5 = vector.broadcast %4 : vector<8x1xf32> to vector<8x128xf32>
    %c0_2 = arith.constant 0 : index
    %c0_3 = arith.constant 0 : index
    %6 = vector.load %arg3[%c0_2, %c0_3] : memref<8x128xi32, #tpu.memory_space<vmem>>, vector<1x128xi32>
    %c0_i32 = arith.constant 0 : i32
    %7 = vector.broadcast %c0_i32 : i32 to vector<1x128xi32>
    %8 = arith.cmpi ne, %6, %7 : vector<1x128xi32>
    %9 = vector.shape_cast %8 : vector<1x128xi1> to vector<1x128xi1>
    %10 = vector.broadcast %9 : vector<1x128xi1> to vector<8x128xi1>
    %11 = arith.select %10, %5, %2 : vector<8x128xi1>, vector<8x128xf32>
    %c0_4 = arith.constant 0 : index
    %c2 = arith.constant 2 : index
    %12 = vector.load %arg2[%c0_4, %c2] : memref<8x12xf32, #tpu.memory_space<vmem>>, vector<8x1xf32>
    %13 = vector.shape_cast %12 : vector<8x1xf32> to vector<8x1xf32>
    %14 = vector.broadcast %13 : vector<8x1xf32> to vector<8x128xf32>
    %c1_5 = arith.constant 1 : index
    %c0_6 = arith.constant 0 : index
    %15 = vector.load %arg3[%c1_5, %c0_6] : memref<8x128xi32, #tpu.memory_space<vmem>>, vector<1x128xi32>
    %c0_i32_7 = arith.constant 0 : i32
    %16 = vector.broadcast %c0_i32_7 : i32 to vector<1x128xi32>
    %17 = arith.cmpi ne, %15, %16 : vector<1x128xi32>
    %18 = vector.shape_cast %17 : vector<1x128xi1> to vector<1x128xi1>
    %19 = vector.broadcast %18 : vector<1x128xi1> to vector<8x128xi1>
    %20 = arith.select %19, %14, %11 : vector<8x128xi1>, vector<8x128xf32>
    %c0_8 = arith.constant 0 : index
    %c3 = arith.constant 3 : index
    %21 = vector.load %arg2[%c0_8, %c3] : memref<8x12xf32, #tpu.memory_space<vmem>>, vector<8x1xf32>
    %22 = vector.shape_cast %21 : vector<8x1xf32> to vector<8x1xf32>
    %23 = vector.broadcast %22 : vector<8x1xf32> to vector<8x128xf32>
    %c0_9 = arith.constant 0 : index
    %c4 = arith.constant 4 : index
    %24 = vector.load %arg2[%c0_9, %c4] : memref<8x12xf32, #tpu.memory_space<vmem>>, vector<8x1xf32>
    %25 = vector.shape_cast %24 : vector<8x1xf32> to vector<8x1xf32>
    %26 = vector.broadcast %25 : vector<8x1xf32> to vector<8x128xf32>
    %c2_10 = arith.constant 2 : index
    %c0_11 = arith.constant 0 : index
    %27 = vector.load %arg3[%c2_10, %c0_11] : memref<8x128xi32, #tpu.memory_space<vmem>>, vector<1x128xi32>
    %c0_i32_12 = arith.constant 0 : i32
    %28 = vector.broadcast %c0_i32_12 : i32 to vector<1x128xi32>
    %29 = arith.cmpi ne, %27, %28 : vector<1x128xi32>
    %30 = vector.shape_cast %29 : vector<1x128xi1> to vector<1x128xi1>
    %31 = vector.broadcast %30 : vector<1x128xi1> to vector<8x128xi1>
    %32 = arith.select %31, %26, %23 : vector<8x128xi1>, vector<8x128xf32>
    %c0_13 = arith.constant 0 : index
    %c5 = arith.constant 5 : index
    %33 = vector.load %arg2[%c0_13, %c5] : memref<8x12xf32, #tpu.memory_space<vmem>>, vector<8x1xf32>
    %34 = vector.shape_cast %33 : vector<8x1xf32> to vector<8x1xf32>
    %35 = vector.broadcast %34 : vector<8x1xf32> to vector<8x128xf32>
    %c3_14 = arith.constant 3 : index
    %c0_15 = arith.constant 0 : index
    %36 = vector.load %arg3[%c3_14, %c0_15] : memref<8x128xi32, #tpu.memory_space<vmem>>, vector<1x128xi32>
    %c0_i32_16 = arith.constant 0 : i32
    %37 = vector.broadcast %c0_i32_16 : i32 to vector<1x128xi32>
    %38 = arith.cmpi ne, %36, %37 : vector<1x128xi32>
    %39 = vector.shape_cast %38 : vector<1x128xi1> to vector<1x128xi1>
    %40 = vector.broadcast %39 : vector<1x128xi1> to vector<8x128xi1>
    %41 = arith.select %40, %35, %32 : vector<8x128xi1>, vector<8x128xf32>
    %42 = arith.mulf %20, %41 : vector<8x128xf32>
    %c0_17 = arith.constant 0 : index
    %c6 = arith.constant 6 : index
    %43 = vector.load %arg2[%c0_17, %c6] : memref<8x12xf32, #tpu.memory_space<vmem>>, vector<8x1xf32>
    %44 = vector.shape_cast %43 : vector<8x1xf32> to vector<8x1xf32>
    %45 = vector.broadcast %44 : vector<8x1xf32> to vector<8x128xf32>
    %c0_18 = arith.constant 0 : index
    %c7 = arith.constant 7 : index
    %46 = vector.load %arg2[%c0_18, %c7] : memref<8x12xf32, #tpu.memory_space<vmem>>, vector<8x1xf32>
    %47 = vector.shape_cast %46 : vector<8x1xf32> to vector<8x1xf32>
    %48 = vector.broadcast %47 : vector<8x1xf32> to vector<8x128xf32>
    %c4_19 = arith.constant 4 : index
    %c0_20 = arith.constant 0 : index
    %49 = vector.load %arg3[%c4_19, %c0_20] : memref<8x128xi32, #tpu.memory_space<vmem>>, vector<1x128xi32>
    %c0_i32_21 = arith.constant 0 : i32
    %50 = vector.broadcast %c0_i32_21 : i32 to vector<1x128xi32>
    %51 = arith.cmpi ne, %49, %50 : vector<1x128xi32>
    %52 = vector.shape_cast %51 : vector<1x128xi1> to vector<1x128xi1>
    %53 = vector.broadcast %52 : vector<1x128xi1> to vector<8x128xi1>
    %54 = arith.select %53, %48, %45 : vector<8x128xi1>, vector<8x128xf32>
    %c0_22 = arith.constant 0 : index
    %c8 = arith.constant 8 : index
    %55 = vector.load %arg2[%c0_22, %c8] : memref<8x12xf32, #tpu.memory_space<vmem>>, vector<8x1xf32>
    %56 = vector.shape_cast %55 : vector<8x1xf32> to vector<8x1xf32>
    %57 = vector.broadcast %56 : vector<8x1xf32> to vector<8x128xf32>
    %c5_23 = arith.constant 5 : index
    %c0_24 = arith.constant 0 : index
    %58 = vector.load %arg3[%c5_23, %c0_24] : memref<8x128xi32, #tpu.memory_space<vmem>>, vector<1x128xi32>
    %c0_i32_25 = arith.constant 0 : i32
    %59 = vector.broadcast %c0_i32_25 : i32 to vector<1x128xi32>
    %60 = arith.cmpi ne, %58, %59 : vector<1x128xi32>
    %61 = vector.shape_cast %60 : vector<1x128xi1> to vector<1x128xi1>
    %62 = vector.broadcast %61 : vector<1x128xi1> to vector<8x128xi1>
    %63 = arith.select %62, %57, %54 : vector<8x128xi1>, vector<8x128xf32>
    %64 = arith.mulf %42, %63 : vector<8x128xf32>
    %c0_26 = arith.constant 0 : index
    %c9 = arith.constant 9 : index
    %65 = vector.load %arg2[%c0_26, %c9] : memref<8x12xf32, #tpu.memory_space<vmem>>, vector<8x1xf32>
    %66 = vector.shape_cast %65 : vector<8x1xf32> to vector<8x1xf32>
    %67 = vector.broadcast %66 : vector<8x1xf32> to vector<8x128xf32>
    %c0_27 = arith.constant 0 : index
    %c10 = arith.constant 10 : index
    %68 = vector.load %arg2[%c0_27, %c10] : memref<8x12xf32, #tpu.memory_space<vmem>>, vector<8x1xf32>
    %69 = vector.shape_cast %68 : vector<8x1xf32> to vector<8x1xf32>
    %70 = vector.broadcast %69 : vector<8x1xf32> to vector<8x128xf32>
    %c6_28 = arith.constant 6 : index
    %c0_29 = arith.constant 0 : index
    %71 = vector.load %arg3[%c6_28, %c0_29] : memref<8x128xi32, #tpu.memory_space<vmem>>, vector<1x128xi32>
    %c0_i32_30 = arith.constant 0 : i32
    %72 = vector.broadcast %c0_i32_30 : i32 to vector<1x128xi32>
    %73 = arith.cmpi ne, %71, %72 : vector<1x128xi32>
    %74 = vector.shape_cast %73 : vector<1x128xi1> to vector<1x128xi1>
    %75 = vector.broadcast %74 : vector<1x128xi1> to vector<8x128xi1>
    %76 = arith.select %75, %70, %67 : vector<8x128xi1>, vector<8x128xf32>
    %c0_31 = arith.constant 0 : index
    %c11 = arith.constant 11 : index
    %77 = vector.load %arg2[%c0_31, %c11] : memref<8x12xf32, #tpu.memory_space<vmem>>, vector<8x1xf32>
    %78 = vector.shape_cast %77 : vector<8x1xf32> to vector<8x1xf32>
    %79 = vector.broadcast %78 : vector<8x1xf32> to vector<8x128xf32>
    %c7_32 = arith.constant 7 : index
    %c0_33 = arith.constant 0 : index
    %80 = vector.load %arg3[%c7_32, %c0_33] : memref<8x128xi32, #tpu.memory_space<vmem>>, vector<1x128xi32>
    %c0_i32_34 = arith.constant 0 : i32
    %81 = vector.broadcast %c0_i32_34 : i32 to vector<1x128xi32>
    %82 = arith.cmpi ne, %80, %81 : vector<1x128xi32>
    %83 = vector.shape_cast %82 : vector<1x128xi1> to vector<1x128xi1>
    %84 = vector.broadcast %83 : vector<1x128xi1> to vector<8x128xi1>
    %85 = arith.select %84, %79, %76 : vector<8x128xi1>, vector<8x128xf32>
    %86 = arith.mulf %64, %85 : vector<8x128xf32>
    %c0_35 = arith.constant 0 : index
    %c0_36 = arith.constant 0 : index
    %87 = vector.load %arg4[%c0_35, %c0_36] : memref<8x128xf32, #tpu.memory_space<vmem>>, vector<8x128xf32>
    tpu.vector_store %arg4[%c0_35, %c0_36], %86 {strides = array<i32>} : memref<8x128xf32, #tpu.memory_space<vmem>>, vector<8x128xf32>,
    return
  }
  func.func @transform_0(%arg0: i32, %arg1: i32) -> (i32, i32) {
    %c0_i32 = arith.constant 0 : i32
    %c0_i32_0 = arith.constant 0 : i32
    return %arg0, %c0_i32 : i32, i32
  }
  func.func @transform_1(%arg0: i32, %arg1: i32) -> (i32, i32) {
    %c0_i32 = arith.constant 0 : i32
    %c0_i32_0 = arith.constant 0 : i32
    return %c0_i32, %arg1 : i32, i32
  }
  func.func @transform_2(%arg0: i32, %arg1: i32) -> (i32, i32) {
    %c0_i32 = arith.constant 0 : i32
    return %arg0, %arg1 : i32, i32
  }
}

</mosaic_0001>

<bundles_post_ra>
// kernel: tpu_custom_call.1
= control target key start
LH: loop header
LB: loop body
LE: loop exit
PB: predicated region body
PF: predicated region fallthrough
CT: control target
= control target key end

     0   :  { %7 = vsyncpa [#allocation3], 0  ;;  %s358_s0 = inlined_call_operand.hbm [shape: f32[8,12], index: 0, kind: input, shape index: {}]   ;;  %s359_s1 = inlined_call_operand.hbm [shape: s32[8,128], index: 1, kind: input, shape index: {}]   ;;  %s360_s2 = inlined_call_operand.hbm [shape: f32[8,128], index: 2, kind: output, shape index: {}]  }
   0x1   :  { %8 = vsyncpa [#allocation6], 0 }
   0x2   :  { %9 = vsyncpa [#allocation4], 0  ;;  %s277_s9 = smov [#allocation2]   ;;  %s278_s11 = smov [#allocation5]  }
   0x3   :  { %s16_s10 = sshll.u32 %s277_s9, 4  ;;  %s26_s12 = sshll.u32 %s278_s11, 4  ;;  %s17_s10 = int_to_ptr.vmem [resolvable:$true] %s16_s10  ;;  %s27_s12 = int_to_ptr.vmem [resolvable:$true] %s26_s12 }
   0x4   :  { %s205_s15 = scalar_lea.hbm %s358_s0, 128 }
   0x5   :  { %p206_p0 = scmp.ne.s32.totalorder %s358_s0, %s205_s15  ;;  %p209_p1 = scmp.lt.u32.totalorder %s205_s15, %s358_s0 }
   0x7   :  { %p211_p2 = pnand %p209_p1, %p206_p0 }
   0x9   :  { %214 = shalt.err (!%p211_p2)
}
   0xa   :  { %s215_s20 = scalar_lea.vmem %s17_s10, 128  ;;  %p220_p4 = scmp.lt.s32.totalorder %s17_s10, %s17_s10 }
   0xb   :  { %p216_p3 = scmp.ne.s32.totalorder %s17_s10, %s215_s20  ;;  %p221_p5 = scmp.lt.s32.totalorder %s215_s20, %s215_s20 }
   0xd   :  { %p222_p6 = por %p221_p5, %p220_p4 }
   0xf   :  { %p223_p7 = pnand %p222_p6, %p216_p3 }
  0x11   :  { %226 = shalt.err (!%p223_p7)
}
  0x12   :  { %19 = dma.hbm_to_vmem [thread:$0]  %s358_s0, 128, %s17_s10, [#allocation3]  }
  0x13   :  { %s227_s25 = scalar_lea.hbm %s359_s1, 128 }
  0x14   :  { %p228_p8 = scmp.ne.s32.totalorder %s359_s1, %s227_s25  ;;  %p231_p9 = scmp.lt.u32.totalorder %s227_s25, %s359_s1 }
  0x16   :  { %p233_p10 = pnand %p231_p9, %p228_p8 }
  0x18   :  { %236 = shalt.err (!%p233_p10)
}
  0x19   :  { %s237_s30 = scalar_lea.vmem %s27_s12, 128  ;;  %p242_p12 = scmp.lt.s32.totalorder %s27_s12, %s27_s12 }
  0x1a   :  { %p238_p11 = scmp.ne.s32.totalorder %s27_s12, %s237_s30  ;;  %p243_p13 = scmp.lt.s32.totalorder %s237_s30, %s237_s30 }
  0x1c   :  { %p244_p0 = por %p243_p13, %p242_p12 }
  0x1e   :  { %p245_p1 = pnand %p244_p0, %p238_p11 }
  0x20   :  { %248 = shalt.err (!%p245_p1)
}
  0x21   :  { %29 = dma.hbm_to_vmem [thread:$0]  %s359_s1, 128, %s27_s12, [#allocation6]  }
  0x22   :  { %271 = dma.done.wait [#allocation3], 128  }
  0x23   :  { %272 = vsyncadd [#allocation3], 4294967168 }
  0x24   :  { %273 = dma.done.wait [#allocation6], 128  }
  0x25   :  { %274 = vsyncadd [#allocation6], 4294967168  ;;  %v279_v0 = vmov 3   ;;  %v280_v1 = vmov 0   ;;  %v36_v2 = vld [vmem:[#allocation2] sm:$0xff]  ;;  %v281_v3 = vmov 4   ;;  %v49_v15 = vlaneseq }
  0x26   :  { %195 = vset.pattern.permute.xlu1 %v279_v0  ;;  %193 = vset.pattern.permute.xlu0 %v280_v1  ;;  %v282_v4 = vmov 1   ;;  %v283_v5 = vmov 2   ;;  %v284_v6 = vmov 5   ;;  %v285_v7 = vmov 6   ;;  %v46_v16 = vld [vmem:[#allocation5] sm:$0x1] }
  0x27   :  { %69 = vperm.xlu1 %195, %v36_v2   ;;  %39 = vperm.xlu0 %193, %v36_v2   ;;  %v286_v8 = vmov 8   ;;  %v287_v9 = vmov 7   ;;  %v288_v10 = vmov 11   ;;  %v289_v11 = vmov 9   ;;  %v76_v18 = vld [vmem:[#allocation5 + $0x2] sm:$0x1] }
  0x28   :  { %v290_v12 = vmov 10   ;;  %v107_v19 = vld [vmem:[#allocation5 + $0x4] sm:$0x1]  ;;  %v50_v20 = vshrl.u32 %v49_v15, 7  ;;  %vm47_vm0 = vcmp.ne.s32.totalorder %v46_v16, 0  ;;  %vm77_vm1 = vcmp.ne.s32.totalorder %v76_v18, 0 }
  0x29   :  { %v59_v21 = vld [vmem:[#allocation5 + $0x1] sm:$0x1]  ;;  %v89_v23 = vld [vmem:[#allocation5 + $0x3] sm:$0x1]  ;;  %vm108_vm2 = vcmp.ne.s32.totalorder %v107_v19, 0  ;;  %v48_v25 = vsel %vm47_vm0, 1, %v280_v1 }
  0x2a   :  { %v120_v24 = vld [vmem:[#allocation5 + $0x5] sm:$0x1]  ;;  %vm60_vm3 = vcmp.ne.s32.totalorder %v59_v21, 0  ;;  %vm90_vm4 = vcmp.ne.s32.totalorder %v89_v23, 0  ;;  %v51_v26 = vsub.s32 0, %v50_v20  ;;  %v78_v27 = vsel %vm77_vm1, 1, %v280_v1 }
  0x2b   :  { %196 = vset.pattern.permute.xlu1 %v281_v3  ;;  %194 = vset.pattern.permute.xlu0 %v282_v4  ;;  %v109_v30 = vsel %vm108_vm2, 1, %v280_v1  ;;  %vm121_vm5 = vcmp.ne.s32.totalorder %v120_v24, 0  ;;  %v138_v31 = vld [vmem:[#allocation5 + $0x6] sm:$0x1]  ;;  %v61_v33 = vsel %vm60_vm3, 1, %v280_v1  ;;  %v91_v34 = vsel %vm90_vm4, 1, %v280_v1 }
  0x2c   :  { %73 = vperm.xlu1 %196, %v36_v2   ;;  %43 = vperm.xlu0 %194, %v36_v2   ;;  %v52_v32 = vrot.slane %v48_v25, %v51_v26  ;;  %v151_v35 = vld [vmem:[#allocation5 + $0x7] sm:$0x1]  ;;  %v82_v36 = vrot.slane %v78_v27, %v51_v26  ;;  %v113_v37 = vrot.slane %v109_v30, %v51_v26  ;;  %v122_v38 = vsel %vm121_vm5, 1, %v280_v1  ;;  %s291_s1 = smov [#allocation7]  }
  0x2d   :  { %vm139_vm6 = vcmp.ne.s32.totalorder %v138_v31, 0  ;;  %v65_v39 = vrot.slane %v61_v33, %v51_v26  ;;  %v95_v40 = vrot.slane %v91_v34, %v51_v26  ;;  %vm152_vm7 = vcmp.ne.s32.totalorder %v151_v35, 0  ;;  %s168_s4 = sshll.u32 %s291_s1, 4  ;;  %s169_s4 = int_to_ptr.vmem [resolvable:$true] %s168_s4 }
  0x2e   :  { %vm338_vm8 = vcmp.eq.s32.totalorder %v52_v32, 1  ;;  %v126_v44 = vrot.slane %v122_v38, %v51_v26  ;;  %v140_v45 = vsel %vm139_vm6, 1, %v280_v1  ;;  %vm83_vm9 = vcmp.eq.s32.totalorder %v82_v36, 1  ;;  %s249_s5 = scalar_lea.vmem %s169_s4, 128  ;;  %p254_p3 = scmp.lt.s32.totalorder %s169_s4, %s169_s4 }
  0x2f   :  { %vm114_vm10 = vcmp.eq.s32.totalorder %v113_v37, 1  ;;  %v153_v46 = vsel %vm152_vm7, 1, %v280_v1  ;;  %vm66_vm11 = vcmp.eq.s32.totalorder %v65_v39, 1  ;;  %vm96_vm12 = vcmp.eq.s32.totalorder %v95_v40, 1  ;;  %p250_p2 = scmp.ne.s32.totalorder %s169_s4, %s249_s5  ;;  %p255_p4 = scmp.lt.s32.totalorder %s249_s5, %s249_s5 }
  0x30   :  { %197 = vset.pattern.permute.xlu1 %v283_v5  ;;  %198 = vset.pattern.permute.xlu0 %v284_v6  ;;  %v144_v48 = vrot.slane %v140_v45, %v51_v26  ;;  %vm127_vm13 = vcmp.eq.s32.totalorder %v126_v44, 1  ;;  %v157_v53 = vrot.slane %v153_v46, %v51_v26 }
  0x31   :  { %56 = vperm.xlu1 %197, %v36_v2   ;;  %86 = vperm.xlu0 %198, %v36_v2   ;;  %p256_p5 = por %p255_p4, %p254_p3 }
  0x32   :  { %vm145_vm14 = vcmp.eq.s32.totalorder %v144_v48, 1  ;;  %vm158_vm15 = vcmp.eq.s32.totalorder %v157_v53, 1 }
  0x33   :  { %p257_p6 = pnand %p256_p5, %p250_p2 }
  0x35   :  { %199 = vset.pattern.permute.xlu1 %v285_v7  ;;  %201 = vset.pattern.permute.xlu0 %v286_v8 }
  0x36   :  { %100 = vperm.xlu1 %199, %v36_v2   ;;  %117 = vperm.xlu0 %201, %v36_v2  }
  0x3a   :  { %200 = vset.pattern.permute.xlu1 %v287_v9  ;;  %204 = vset.pattern.permute.xlu0 %v288_v10 }
  0x3b   :  { %104 = vperm.xlu1 %200, %v36_v2   ;;  %148 = vperm.xlu0 %204, %v36_v2  }
  0x3f   :  { %202 = vset.pattern.permute.xlu1 %v289_v11 }
  0x40   :  { %131 = vperm.xlu1 %202, %v36_v2  }
  0x44   :  { %203 = vset.pattern.permute.xlu1 %v290_v12 }
  0x45   :  { %135 = vperm.xlu1 %203, %v36_v2  }
  0xa6   :  { %v70_v13 = vpop.permute.xlu1 %69  ;;  %v40_v17 = vpop.permute.xlu0 %39 }
  0xab   :  { %v74_v14 = vpop.permute.xlu1 %73  ;;  %v44_v28 = vpop.permute.xlu0 %43 }
  0xac   :  { %v54_v47 = vsel %vm338_vm8, %v44_v28, %v40_v17  ;;  %v84_v49 = vsel %vm83_vm9, %v74_v14, %v70_v13 }
  0xb0   :  { %v57_v22 = vpop.permute.xlu1 %56  ;;  %v87_v43 = vpop.permute.xlu0 %86 }
  0xb1   :  { %v67_v54 = vsel %vm66_vm11, %v57_v22, %v54_v47  ;;  %v97_v55 = vsel %vm96_vm12, %v87_v43, %v84_v49 }
  0xb2   :  { %v98_v57 = vmul.f32 %v97_v55, %v67_v54 }
  0xb5   :  { %v101_v29 = vpop.permute.xlu1 %100  ;;  %v118_v51 = vpop.permute.xlu0 %117 }
  0xba   :  { %v105_v42 = vpop.permute.xlu1 %104  ;;  %v149_v58 = vpop.permute.xlu0 %148 }
  0xbb   :  { %v115_v50 = vsel %vm114_vm10, %v105_v42, %v101_v29 }
  0xbc   :  { %v128_v56 = vsel %vm127_vm13, %v118_v51, %v115_v50 }
  0xbd   :  { %v129_v60 = vmul.f32 %v128_v56, %v98_v57 }
  0xbf   :  { %v132_v52 = vpop.permute.xlu1 %131 }
  0xc4   :  { %v136_v59 = vpop.permute.xlu1 %135 }
  0xc5   :  { %v146_v61 = vsel %vm145_vm14, %v136_v59, %v132_v52 }
  0xc6   :  { %v159_v62 = vsel %vm158_vm15, %v149_v58, %v146_v61 }
  0xc7   :  { %v160_v63 = vmul.f32 %v159_v62, %v129_v60 }
  0xc9   :  { %161 = vst [vmem:[#allocation7] sm:$0xff] %v160_v63 }
  0xca   :  { %260 = shalt.err (!%p257_p6)
}
  0xcb   :  { %s261_s8 = scalar_lea.hbm %s360_s2, 128 }
  0xcc   :  { %p262_p7 = scmp.ne.s32.totalorder %s360_s2, %s261_s8  ;;  %p265_p8 = scmp.lt.u32.totalorder %s261_s8, %s360_s2 }
  0xce   :  { %p267_p9 = pnand %p265_p8, %p262_p7 }
  0xd0   :  { %270 = shalt.err (!%p267_p9)
}
  0xd1   :  { %171 = dma.vmem_to_hbm [thread:$0]  %s169_s4, 128, %s360_s2, [#allocation4]  }
  0xd2   :  { %275 = dma.done.wait [#allocation4], 128  }
  0xd3   :  { %276 = vsyncadd [#allocation4], 4294967168 }
  0xd4   :  { %175 = vsyncpa [#allocation3], 1 }
  0xd5   :  { %176 = vsyncpa [#allocation6], 1 }
  0xd6   :  { %177 = vsyncpa [#allocation4], 1 }

</bundles_post_ra>
